<compile_context>
chip_gen: v6e
topology: v6e:2x2x1
jax: 0.10.0
libtpu: 0.0.40
codegen_flags: <defaults>
</compile_context>

<pallas_src>
import functools

import jax
import jax.numpy as jnp
import numpy as np
from jax import lax
from jax.experimental import pallas as pl
from jax.experimental.pallas import tpu as pltpu

N_BINS = 15


def conf_acc_kernel(logits_ref, labels_ref, out_ref, *, n_bins, exp_dtype):
    j = pl.program_id(0)

    @pl.when(j == 0)
    def _():
        out_ref[...] = jnp.zeros_like(out_ref)

    x = logits_ref[...].astype(jnp.float32)                      # (TN, C)
    _, c = x.shape

    # --- single fused pass over the (TN, C) tile ---------------------------
    maxv = jnp.max(x, axis=-1, keepdims=True)                    # (TN, 1)
    d = x - maxv                                                 # (TN, C) reused below
    e = jnp.exp(d.astype(exp_dtype))                             # EUP; optional bf16
    denom = jnp.sum(e.astype(jnp.float32), axis=-1, keepdims=True)
    conf = 1.0 / denom                                           # max softmax prob

    # First index attaining the max (torch.max tie semantics); only a (1, C)
    # iota is generated, broadcast inside the select.
    col = lax.broadcasted_iota(jnp.int32, (1, c), 1)
    pred = jnp.min(jnp.where(d >= 0.0, col, c), axis=-1, keepdims=True)  # (TN, 1)

    # --- per-row side work (small (TN,1)/(TN,NB) intermediates) ------------
    labels = labels_ref[...]                                     # (TN, 1); padded rows = -1
    valid = (labels >= 0).astype(jnp.float32)
    acc = ((pred == labels) & (labels >= 0)).astype(jnp.float32)

    # Direct bin index; clamp keeps conf == 1.0 inside the closed last bin.
    bin_idx = jnp.clip(jnp.floor(conf * n_bins).astype(jnp.int32), 0, n_bins - 1)
    bins = lax.broadcasted_iota(jnp.int32, (1, n_bins), 1)
    hit = bin_idx == bins                                        # (TN, NB)

    corr = jnp.sum(jnp.where(hit, acc, 0.0), axis=0, keepdims=True)    # (1, NB)
    tot = jnp.sum(jnp.where(hit, valid, 0.0), axis=0, keepdims=True)   # (1, NB)
    out_ref[...] += jnp.concatenate([corr, tot], axis=0)                # (2, NB)


def conf_acc_loss(logits, labels, n_bins=N_BINS, tile_n=1024,
                  exp_dtype=jnp.float32, tile_bytes=2 * 1024 * 1024):
    n, c = logits.shape
    labels = labels.astype(jnp.int32)

    # ~2 MiB logits tiles: double-buffered input plus the tile-sized in-kernel
    # temporaries (d, exp, argmax select) stays ~10 MiB peak — inside the
    # scoped-VMEM default on every generation (v7x has only 64 MiB physical).
    bytes_per_row = max(1, c) * jnp.dtype(logits.dtype).itemsize
    max_rows = max(8, ((tile_bytes // bytes_per_row) // 8) * 8)
    tile_n = min(tile_n, max_rows)
    tile_n = min(tile_n, max(8, ((n + 7) // 8) * 8))             # avoid over-padding tiny N

    n_pad = pl.cdiv(n, tile_n) * tile_n
    if n_pad != n:
        logits = jnp.pad(logits, ((0, n_pad - n), (0, 0)))
        labels = jnp.pad(labels, ((0, n_pad - n),), constant_values=-1)
    labels2d = labels.reshape(n_pad, 1)
    n_tiles = n_pad // tile_n

    kernel = functools.partial(conf_acc_kernel, n_bins=n_bins, exp_dtype=exp_dtype)
    out = pl.pallas_call(
        kernel,
        out_shape=jax.ShapeDtypeStruct((2, n_bins), jnp.float32),
        grid=(n_tiles,),
        in_specs=[
            pl.BlockSpec((tile_n, c), lambda j: (j, 0)),
            pl.BlockSpec((tile_n, 1), lambda j: (j, 0)),
        ],
        out_specs=pl.BlockSpec((2, n_bins), lambda j: (0, 0)),
        compiler_params=pltpu.CompilerParams(
            dimension_semantics=("arbitrary",),
            vmem_limit_bytes=32 * 1024 * 1024,
        ),
    )(logits, labels2d)

    # Rows: [correct_per_bin, total_per_bin] -> PyTorch (n_bins, 2) layout
    # with column 1 = incorrect = total - correct.
    correct = out[0]
    total = out[1]
    return jnp.stack([correct, total - correct], axis=1)


def conf_acc_loss_ref(logits, labels, n_bins=N_BINS):
    """Pure-JAX reference matching the PyTorch module."""
    sm = jax.nn.softmax(logits, axis=1)
    conf = jnp.max(sm, axis=1)
    pred = jnp.argmax(sm, axis=1)
    acc = pred == labels
    b = np.linspace(0.0, 1.0, n_bins + 1)
    rows = []
    for i in range(n_bins):
        lo, hi = b[i], b[i + 1]
        if i == n_bins - 1:
            in_bin = (conf >= lo) & (conf <= hi)
        else:
            in_bin = (conf >= lo) & (conf < hi)
        correct = jnp.sum(jnp.where(in_bin, acc, False).astype(jnp.float32))
        total = jnp.sum(in_bin.astype(jnp.float32))
        rows.append(jnp.stack([correct, total - correct]))
    return jnp.stack(rows)


if __name__ == "__main__":
    key = jax.random.PRNGKey(0)
    k1, k2 = jax.random.split(key)
    N, C = 128, 16
    logits = jax.random.normal(k1, (N, C), dtype=jnp.float32) * 3.0
    labels = jax.random.randint(k2, (N,), 0, C, dtype=jnp.int32)

    bin_stats = conf_acc_loss(logits, labels)
    jax.block_until_ready(bin_stats)

    ref = conf_acc_loss_ref(logits, labels)
    assert bin_stats.shape == (N_BINS, 2)
    assert np.allclose(np.asarray(bin_stats), np.asarray(ref)), (bin_stats, ref)
    print("KERNEL_OK")
</pallas_src>

<mosaic_0001>
module attributes {stable_mosaic.version = 11 : i64} {
  func.func @conf_acc_kernel(%arg0: i32, %arg1: memref<128x16xf32, #tpu.memory_space<vmem>>, %arg2: memref<128x1xi32, #tpu.memory_space<vmem>>, %arg3: memref<2x15xf32, #tpu.memory_space<vmem>>) attributes {dimension_semantics = [#tpu.dimension_semantics<arbitrary>], iteration_bounds = array<i64: 1>, scalar_prefetch = 0 : i64, scratch_operands = 0 : i64, tpu.core_type = #tpu.core_type<tc>, window_params = [{transform_indices = @transform_0, window_bounds = array<i64: 128, 16>}, {transform_indices = @transform_1, window_bounds = array<i64: 128, 1>}, {pipeline_mode = #tpu.pipeline_mode<synchronous>, transform_indices = @transform_2, window_bounds = array<i64: 2, 15>}]} {
    %c0_i32 = arith.constant 0 : i32
    %0 = arith.cmpi eq, %arg0, %c0_i32 : i32
    %1 = arith.extui %0 : i1 to i32
    %c0_i32_0 = arith.constant 0 : i32
    %2 = arith.cmpi ne, %1, %c0_i32_0 : i32
    scf.if %2 {
      %cst_20 = arith.constant 0.000000e+00 : f32
      %61 = vector.broadcast %cst_20 : f32 to vector<2x15xf32>
      %c0_21 = arith.constant 0 : index
      %c0_22 = arith.constant 0 : index
      %62 = vector.load %arg3[%c0_21, %c0_22] : memref<2x15xf32, #tpu.memory_space<vmem>>, vector<2x15xf32>
      tpu.vector_store %arg3[%c0_21, %c0_22], %61 {strides = array<i32>} : memref<2x15xf32, #tpu.memory_space<vmem>>, vector<2x15xf32>,
    } else {
    }
    %c0 = arith.constant 0 : index
    %c0_1 = arith.constant 0 : index
    %3 = vector.load %arg1[%c0, %c0_1] : memref<128x16xf32, #tpu.memory_space<vmem>>, vector<128x16xf32>
    %cst = arith.constant dense<0xFF800000> : vector<128xf32>
    %4 = vector.multi_reduction <maximumf>, %3, %cst [1] : vector<128x16xf32> to vector<128xf32>
    %5 = vector.shape_cast %4 : vector<128xf32> to vector<128x1xf32>
    %6 = vector.broadcast %5 : vector<128x1xf32> to vector<128x16xf32>
    %7 = arith.subf %3, %6 : vector<128x16xf32>
    %8 = math.exp %7 : vector<128x16xf32>
    %cst_2 = arith.constant dense<0.000000e+00> : vector<128xf32>
    %9 = vector.multi_reduction <add>, %8, %cst_2 [1] : vector<128x16xf32> to vector<128xf32>
    %10 = vector.shape_cast %9 : vector<128xf32> to vector<128x1xf32>
    %cst_3 = arith.constant 1.000000e+00 : f32
    %11 = vector.broadcast %cst_3 : f32 to vector<128x1xf32>
    %12 = arith.divf %11, %10 : vector<128x1xf32>
    %13 = tpu.iota {dimensions = array<i32: 1>} : vector<1x16xi32>
    %cst_4 = arith.constant 0.000000e+00 : f32
    %14 = vector.broadcast %cst_4 : f32 to vector<128x16xf32>
    %15 = arith.cmpf oge, %7, %14 : vector<128x16xf32>
    %c16_i32 = arith.constant 16 : i32
    %16 = vector.shape_cast %13 : vector<1x16xi32> to vector<1x16xi32>
    %17 = vector.broadcast %16 : vector<1x16xi32> to vector<128x16xi32>
    %18 = vector.broadcast %c16_i32 : i32 to vector<128x16xi32>
    %19 = arith.select %15, %17, %18 : vector<128x16xi1>, vector<128x16xi32>
    %cst_5 = arith.constant dense<2147483647> : vector<128xi32>
    %20 = vector.multi_reduction <minsi>, %19, %cst_5 [1] : vector<128x16xi32> to vector<128xi32>
    %21 = vector.shape_cast %20 : vector<128xi32> to vector<128x1xi32>
    %c0_6 = arith.constant 0 : index
    %c0_7 = arith.constant 0 : index
    %22 = vector.load %arg2[%c0_6, %c0_7] : memref<128x1xi32, #tpu.memory_space<vmem>>, vector<128x1xi32>
    %c0_i32_8 = arith.constant 0 : i32
    %23 = vector.broadcast %c0_i32_8 : i32 to vector<128x1xi32>
    %24 = arith.cmpi sge, %22, %23 : vector<128x1xi32>
    %25 = arith.extui %24 : vector<128x1xi1> to vector<128x1xi32>
    %26 = arith.sitofp %25 : vector<128x1xi32> to vector<128x1xf32>
    %27 = arith.cmpi eq, %21, %22 : vector<128x1xi32>
    %c0_i32_9 = arith.constant 0 : i32
    %28 = vector.broadcast %c0_i32_9 : i32 to vector<128x1xi32>
    %29 = arith.cmpi sge, %22, %28 : vector<128x1xi32>
    %30 = arith.andi %27, %29 : vector<128x1xi1>
    %31 = arith.extui %30 : vector<128x1xi1> to vector<128x1xi32>
    %32 = arith.sitofp %31 : vector<128x1xi32> to vector<128x1xf32>
    %cst_10 = arith.constant 1.500000e+01 : f32
    %33 = vector.broadcast %cst_10 : f32 to vector<128x1xf32>
    %34 = arith.mulf %12, %33 : vector<128x1xf32>
    %35 = math.floor %34 : vector<128x1xf32>
    %36 = arith.fptosi %35 : vector<128x1xf32> to vector<128x1xi32>
    %c0_i32_11 = arith.constant 0 : i32
    %c14_i32 = arith.constant 14 : i32
    %37 = vector.broadcast %c0_i32_11 : i32 to vector<128x1xi32>
    %38 = arith.maxsi %37, %36 : vector<128x1xi32>
    %39 = vector.broadcast %c14_i32 : i32 to vector<128x1xi32>
    %40 = arith.minsi %39, %38 : vector<128x1xi32>
    %41 = tpu.iota {dimensions = array<i32: 1>} : vector<1x15xi32>
    %42 = vector.broadcast %40 : vector<128x1xi32> to vector<128x15xi32>
    %43 = vector.broadcast %41 : vector<1x15xi32> to vector<128x15xi32>
    %44 = arith.cmpi eq, %42, %43 : vector<128x15xi32>
    %cst_12 = arith.constant 0.000000e+00 : f32
    %45 = vector.shape_cast %32 : vector<128x1xf32> to vector<128x1xf32>
    %46 = vector.broadcast %45 : vector<128x1xf32> to vector<128x15xf32>
    %47 = vector.broadcast %cst_12 : f32 to vector<128x15xf32>
    %48 = arith.select %44, %46, %47 : vector<128x15xi1>, vector<128x15xf32>
    %cst_13 = arith.constant dense<0.000000e+00> : vector<15xf32>
    %49 = vector.multi_reduction <add>, %48, %cst_13 [0] : vector<128x15xf32> to vector<15xf32>
    %50 = vector.shape_cast %49 : vector<15xf32> to vector<1x15xf32>
    %cst_14 = arith.constant 0.000000e+00 : f32
    %51 = vector.shape_cast %26 : vector<128x1xf32> to vector<128x1xf32>
    %52 = vector.broadcast %51 : vector<128x1xf32> to vector<128x15xf32>
    %53 = vector.broadcast %cst_14 : f32 to vector<128x15xf32>
    %54 = arith.select %44, %52, %53 : vector<128x15xi1>, vector<128x15xf32>
    %cst_15 = arith.constant dense<0.000000e+00> : vector<15xf32>
    %55 = vector.multi_reduction <add>, %54, %cst_15 [0] : vector<128x15xf32> to vector<15xf32>
    %56 = vector.shape_cast %55 : vector<15xf32> to vector<1x15xf32>
    %c0_16 = arith.constant 0 : index
    %c0_17 = arith.constant 0 : index
    %57 = vector.load %arg3[%c0_16, %c0_17] : memref<2x15xf32, #tpu.memory_space<vmem>>, vector<2x15xf32>
    %58 = tpu.concatenate %50, %56 in 0 : vector<1x15xf32>, vector<1x15xf32> -> vector<2x15xf32>
    %59 = arith.addf %57, %58 : vector<2x15xf32>
    %c0_18 = arith.constant 0 : index
    %c0_19 = arith.constant 0 : index
    %60 = vector.load %arg3[%c0_18, %c0_19] : memref<2x15xf32, #tpu.memory_space<vmem>>, vector<2x15xf32>
    tpu.vector_store %arg3[%c0_18, %c0_19], %59 {strides = array<i32>} : memref<2x15xf32, #tpu.memory_space<vmem>>, vector<2x15xf32>,
    return
  }
  func.func @transform_0(%arg0: i32) -> (i32, i32) {
    %c0_i32 = arith.constant 0 : i32
    %c0_i32_0 = arith.constant 0 : i32
    return %arg0, %c0_i32 : i32, i32
  }
  func.func @transform_1(%arg0: i32) -> (i32, i32) {
    %c0_i32 = arith.constant 0 : i32
    %c0_i32_0 = arith.constant 0 : i32
    return %arg0, %c0_i32 : i32, i32
  }
  func.func @transform_2(%arg0: i32) -> (i32, i32) {
    %c0_i32 = arith.constant 0 : i32
    %c0_i32_0 = arith.constant 0 : i32
    %c0_i32_1 = arith.constant 0 : i32
    return %c0_i32, %c0_i32_0 : i32, i32
  }
}

</mosaic_0001>

<bundles_post_ra>
// kernel: tpu_custom_call.1
= control target key start
LH: loop header
LB: loop body
LE: loop exit
PB: predicated region body
PF: predicated region fallthrough
CT: control target
= control target key end

     0   :  { %vm34_vm0 = vcmask 130048   ;;  %s2123_s0 = inlined_call_operand.vmem [shape: f32[128,16], index: 0, kind: input, shape index: {}]   ;;  %s2124_s1 = inlined_call_operand.vmem [shape: s32[128,1], index: 1, kind: input, shape index: {}]   ;;  %s2125_s2 = inlined_call_operand.hbm [shape: f32[2,15], index: 2, kind: output, shape index: {}]  }
   0x1   :  { %v18_v0 = vld [vmem:[%s2123_s0] sm:$0xff]  ;;  %v20_v1 = vld [vmem:[%s2123_s0 + $0x10] sm:$0xff]  ;;  %v19_v2 = vld [vmem:[%s2123_s0 + $0x8] sm:$0xff] }
   0x2   :  { %v35_v3 = vsel %vm34_vm0, %v18_v0, -inf  ;;  %v41_v4 = vsel %vm34_vm0, %v20_v1, -inf  ;;  %v21_v5 = vld [vmem:[%s2123_s0 + $0x18] sm:$0xff]  ;;  %v38_v6 = vsel %vm34_vm0, %v19_v2, -inf  ;;  %v1300_v8 = vld [vmem:[%s2123_s0 + $0x20] sm:$0xff]  ;;  %v1305_v9 = vld [vmem:[%s2123_s0 + $0x28] sm:$0xff] }
   0x3   :  { %36 = vmax.xlane.f32.xlu0 %v35_v3  ;;  %42 = vmax.xlane.f32.xlu1 %v41_v4  ;;  %v44_v7 = vsel %vm34_vm0, %v21_v5, -inf }
   0x7   :  { %39 = vmax.xlane.f32.xlu0 %v38_v6  ;;  %45 = vmax.xlane.f32.xlu1 %v44_v7 }
   0x8   :  { %7 = vsyncpa [#allocation3], 0  ;;  %v47_v10 = vsel %vm34_vm0, %v1300_v8, -inf  ;;  %v50_v11 = vsel %vm34_vm0, %v1305_v9, -inf  ;;  %v1314_v12 = vld [vmem:[%s2123_s0 + $0x30] sm:$0xff]  ;;  %v1319_v13 = vld [vmem:[%s2123_s0 + $0x38] sm:$0xff]  ;;  %v211_v32 = vlaneseq }
   0x9   :  { %v53_v14 = vsel %vm34_vm0, %v1314_v12, -inf  ;;  %v56_v15 = vsel %vm34_vm0, %v1319_v13, -inf  ;;  %v1328_v16 = vld [vmem:[%s2123_s0 + $0x40] sm:$0xff]  ;;  %v1333_v17 = vld [vmem:[%s2123_s0 + $0x48] sm:$0xff]  ;;  %v1342_v20 = vld [vmem:[%s2123_s0 + $0x50] sm:$0xff] }
   0xa   :  { %v59_v18 = vsel %vm34_vm0, %v1328_v16, -inf  ;;  %v62_v19 = vsel %vm34_vm0, %v1333_v17, -inf  ;;  %v1347_v21 = vld [vmem:[%s2123_s0 + $0x58] sm:$0xff]  ;;  %v65_v22 = vsel %vm34_vm0, %v1342_v20, -inf  ;;  %v1356_v24 = vld [vmem:[%s2123_s0 + $0x60] sm:$0xff]  ;;  %v1361_v25 = vld [vmem:[%s2123_s0 + $0x68] sm:$0xff] }
   0xb   :  { %48 = vmax.xlane.f32.xlu0 %v47_v10  ;;  %51 = vmax.xlane.f32.xlu1 %v50_v11  ;;  %v68_v23 = vsel %vm34_vm0, %v1347_v21, -inf  ;;  %v71_v26 = vsel %vm34_vm0, %v1356_v24, -inf  ;;  %v74_v27 = vsel %vm34_vm0, %v1361_v25, -inf  ;;  %v1370_v28 = vld [vmem:[%s2123_s0 + $0x70] sm:$0xff]  ;;  %v1375_v29 = vld [vmem:[%s2123_s0 + $0x78] sm:$0xff]  ;;  %v1381_v33 = vand.u32 127, %v211_v32 }
   0xc   :  { %v77_v30 = vsel %vm34_vm0, %v1370_v28, -inf  ;;  %v80_v31 = vsel %vm34_vm0, %v1375_v29, -inf }
   0xf   :  { %54 = vmax.xlane.f32.xlu0 %v53_v14  ;;  %57 = vmax.xlane.f32.xlu1 %v56_v15 }
  0x13   :  { %60 = vmax.xlane.f32.xlu0 %v59_v18  ;;  %63 = vmax.xlane.f32.xlu1 %v62_v19 }
  0x17   :  { %66 = vmax.xlane.f32.xlu0 %v65_v22  ;;  %69 = vmax.xlane.f32.xlu1 %v68_v23 }
  0x1b   :  { %72 = vmax.xlane.f32.xlu0 %v71_v26  ;;  %75 = vmax.xlane.f32.xlu1 %v74_v27 }
  0x1f   :  { %78 = vmax.xlane.f32.xlu0 %v77_v30  ;;  %81 = vmax.xlane.f32.xlu1 %v80_v31 }
  0x8c   :  { %v37_v34 = vpop.xlane.xlu0 %36  ;;  %v43_v35 = vpop.xlane.xlu1 %42 }
  0x8d   :  { %v1383_v36 = vsub.f32 %v18_v0, %v37_v34  ;;  %v1385_v37 = vsub.f32 %v20_v1, %v43_v35 }
  0x8f   :  { %vm213_vm1 = vcmp.ge.f32.partialorder %v1383_v36, 0.0  ;;  %vm215_vm2 = vcmp.ge.f32.partialorder %v1385_v37, 0.0  ;;  %v99_v31 = vmul.f32 1.442695, %v1383_v36 }
  0x90   :  { %v229_v38 = vsel %vm213_vm1, %v1381_v33, 16  ;;  %v231_v39 = vsel %vm215_vm2, %v1381_v33, 16  ;;  %v40_v40 = vpop.xlane.xlu0 %39  ;;  %v46_v41 = vpop.xlane.xlu1 %45 }
  0x91   :  { %v1391_v42 = vsub.f32 %v19_v2, %v40_v40  ;;  %v1393_v43 = vsub.f32 %v21_v5, %v46_v41  ;;  %v1396_v44 = vsel %vm34_vm0, %v229_v38, 2147483647  ;;  %v1400_v46 = vsel %vm34_vm0, %v231_v39, 2147483647 }
  0x92   :  { %v247_v45 = vshra.s32 %v1396_v44, 16  ;;  %v277_v52 = vshra.s32 %v1400_v46, 16  ;;  %v103_v38 = vmul.f32 1.442695, %v1385_v37  ;;  %1177 = vpow2.f32 %v99_v31 }
  0x93   :  { %vm214_vm3 = vcmp.ge.f32.partialorder %v1391_v42, 0.0  ;;  %vm216_vm4 = vcmp.ge.f32.partialorder %v1393_v43, 0.0 }
  0x94   :  { %v230_v47 = vsel %vm214_vm3, %v1381_v33, 16  ;;  %v232_v48 = vsel %vm216_vm4, %v1381_v33, 16  ;;  %v49_v49 = vpop.xlane.xlu0 %48  ;;  %v1406_v50 = vcvt.s32.f32 %v247_v45  ;;  %v52_v51 = vpop.xlane.xlu1 %51  ;;  %v1419_v56 = vcvt.s32.f32 %v277_v52 }
  0x95   :  { %v1410_v53 = vsub.f32 %v1300_v8, %v49_v49  ;;  %v1413_v54 = vsub.f32 %v1305_v9, %v52_v51  ;;  %v1416_v55 = vsel %vm34_vm0, %v230_v47, 2147483647  ;;  %v1423_v58 = vsel %vm34_vm0, %v232_v48, 2147483647 }
  0x96   :  { %250 = vmin.xlane.f32.xlu0 %v1406_v50  ;;  %v262_v57 = vshra.s32 %v1416_v55, 16  ;;  %v292_v0 = vshra.s32 %v1423_v58, 16  ;;  %1179 = vpow2.f32 %v103_v38 }
  0x97   :  { %vm217_vm5 = vcmp.ge.f32.partialorder %v1410_v53, 0.0  ;;  %vm218_vm6 = vcmp.ge.f32.partialorder %v1413_v54, 0.0 }
  0x98   :  { %v233_v59 = vsel %vm217_vm5, %v1381_v33, 16  ;;  %v234_v60 = vsel %vm218_vm6, %v1381_v33, 16  ;;  %v55_v61 = vpop.xlane.xlu0 %54  ;;  %v1429_v62 = vcvt.s32.f32 %v262_v57  ;;  %v58_v63 = vpop.xlane.xlu1 %57  ;;  %v1443_v4 = vcvt.s32.f32 %v292_v0 }
  0x99   :  { %v1433_v1 = vsub.f32 %v1314_v12, %v55_v61  ;;  %v1436_v2 = vsub.f32 %v1319_v13, %v58_v63  ;;  %v1439_v3 = vsel %vm34_vm0, %v233_v59, 2147483647  ;;  %v1447_v6 = vsel %vm34_vm0, %v234_v60, 2147483647 }
  0x9a   :  { %280 = vmin.xlane.f32.xlu0 %v1419_v56  ;;  %265 = vmin.xlane.f32.xlu1 %v1429_v62  ;;  %v307_v5 = vshra.s32 %v1439_v3, 16  ;;  %v322_v12 = vshra.s32 %v1447_v6, 16 }
  0x9b   :  { %vm219_vm7 = vcmp.ge.f32.partialorder %v1433_v1, 0.0  ;;  %vm220_vm8 = vcmp.ge.f32.partialorder %v1436_v2, 0.0 }
  0x9c   :  { %v235_v7 = vsel %vm219_vm7, %v1381_v33, 16  ;;  %v236_v8 = vsel %vm220_vm8, %v1381_v33, 16  ;;  %v61_v9 = vpop.xlane.xlu0 %60  ;;  %v1453_v10 = vcvt.s32.f32 %v307_v5  ;;  %v64_v11 = vpop.xlane.xlu1 %63  ;;  %v1467_v18 = vcvt.s32.f32 %v322_v12 }
  0x9d   :  { %v1457_v13 = vsub.f32 %v1328_v16, %v61_v9  ;;  %v1460_v14 = vsub.f32 %v1333_v17, %v64_v11  ;;  %v1463_v15 = vsel %vm34_vm0, %v235_v7, 2147483647  ;;  %v1471_v22 = vsel %vm34_vm0, %v236_v8, 2147483647 }
  0x9e   :  { %295 = vmin.xlane.f32.xlu1 %v1443_v4  ;;  %310 = vmin.xlane.f32.xlu0 %v1453_v10  ;;  %v337_v19 = vshra.s32 %v1463_v15, 16  ;;  %v352_v30 = vshra.s32 %v1471_v22, 16  ;;  %v107_v7 = vmul.f32 1.442695, %v1410_v53 }
  0x9f   :  { %vm221_vm9 = vcmp.ge.f32.partialorder %v1457_v13, 0.0  ;;  %vm222_vm10 = vcmp.ge.f32.partialorder %v1460_v14, 0.0 }
  0xa0   :  { %v237_v16 = vsel %vm221_vm9, %v1381_v33, 16  ;;  %v238_v17 = vsel %vm222_vm10, %v1381_v33, 16  ;;  %v67_v23 = vpop.xlane.xlu0 %66  ;;  %v1477_v26 = vcvt.s32.f32 %v337_v19  ;;  %v70_v27 = vpop.xlane.xlu1 %69  ;;  %v1493_v39 = vcvt.s32.f32 %v352_v30 }
  0xa1   :  { %v1482_v32 = vsub.f32 %v1342_v20, %v67_v23  ;;  %v1485_v34 = vsub.f32 %v1347_v21, %v70_v27  ;;  %v1488_v35 = vsel %vm34_vm0, %v237_v16, 2147483647  ;;  %v1497_v36 = vsel %vm34_vm0, %v238_v17, 2147483647 }
  0xa2   :  { %325 = vmin.xlane.f32.xlu1 %v1467_v18  ;;  %340 = vmin.xlane.f32.xlu0 %v1477_v26  ;;  %v367_v40 = vshra.s32 %v1488_v35, 16  ;;  %v101_v20 = vmul.f32 1.442695, %v1391_v42  ;;  %v382_v48 = vshra.s32 %v1497_v36, 16  ;;  %v111_v23 = vmul.f32 1.442695, %v1433_v1 }
  0xa3   :  { %vm223_vm11 = vcmp.ge.f32.partialorder %v1482_v32, 0.0  ;;  %vm224_vm12 = vcmp.ge.f32.partialorder %v1485_v34, 0.0 }
  0xa4   :  { %v239_v21 = vsel %vm223_vm11, %v1381_v33, 16  ;;  %v240_v37 = vsel %vm224_vm12, %v1381_v33, 16  ;;  %v73_v41 = vpop.xlane.xlu0 %72  ;;  %v1504_v45 = vcvt.s32.f32 %v367_v40  ;;  %v76_v47 = vpop.xlane.xlu1 %75  ;;  %v1518_v52 = vcvt.s32.f32 %v382_v48 }
  0xa5   :  { %v1508_v49 = vsub.f32 %v1356_v24, %v73_v41  ;;  %v1511_v42 = vsub.f32 %v1361_v25, %v76_v47  ;;  %v1514_v51 = vsel %vm34_vm0, %v239_v21, 2147483647  ;;  %v1522_v59 = vsel %vm34_vm0, %v240_v37, 2147483647  ;;  %v1178_v21 = vpop.eup %1177 }
  0xa6   :  { %355 = vmin.xlane.f32.xlu1 %v1493_v39  ;;  %370 = vmin.xlane.f32.xlu0 %v1504_v45  ;;  %v397_v57 = vshra.s32 %v1514_v51, 16  ;;  %1181 = vpow2.f32 %v101_v20  ;;  %v105_v24 = vmul.f32 1.442695, %v1393_v43  ;;  %v412_v5 = vshra.s32 %v1522_v59, 16  ;;  %v1180_v41 = vpop.eup %1179 }
  0xa7   :  { %vm225_vm13 = vcmp.ge.f32.partialorder %v1508_v49, 0.0  ;;  %vm226_vm14 = vcmp.ge.f32.partialorder %v1511_v42, 0.0  ;;  %v113_v40 = vmul.f32 1.442695, %v1436_v2  ;;  %v115_v20 = vmul.f32 1.442695, %v1457_v13 }
  0xa8   :  { %v241_v25 = vsel %vm225_vm13, %v1381_v33, 16  ;;  %v242_v60 = vsel %vm226_vm14, %v1381_v33, 16  ;;  %v79_v61 = vpop.xlane.xlu0 %78  ;;  %v1529_v63 = vcvt.s32.f32 %v397_v57  ;;  %v82_v0 = vpop.xlane.xlu1 %81  ;;  %v1544_v11 = vcvt.s32.f32 %v412_v5 }
  0xa9   :  { %v1534_v8 = vsub.f32 %v1370_v28, %v79_v61  ;;  %v1537_v43 = vsub.f32 %v1375_v29, %v82_v0  ;;  %v1540_v9 = vsel %vm34_vm0, %v241_v25, 2147483647  ;;  %v1548_v19 = vsel %vm34_vm0, %v242_v60, 2147483647 }
  0xaa   :  { %385 = vmin.xlane.f32.xlu1 %v1518_v52  ;;  %400 = vmin.xlane.f32.xlu0 %v1529_v63  ;;  %v427_v12 = vshra.s32 %v1540_v9, 16  ;;  %1183 = vpow2.f32 %v105_v24  ;;  %v109_v28 = vmul.f32 1.442695, %v1413_v54  ;;  %v442_v17 = vshra.s32 %v1548_v19, 16 }
  0xab   :  { %vm227_vm15 = vcmp.ge.f32.partialorder %v1534_v8, 0.0  ;;  %vm228_vm1 = vcmp.ge.f32.partialorder %v1537_v43, 0.0  ;;  %1185 = vpow2.f32 %v107_v7  ;;  %v117_v48 = vmul.f32 1.442695, %v1460_v14 }
  0xac   :  { %v243_v29 = vsel %vm227_vm15, %v1381_v33, 16  ;;  %v244_v53 = vsel %vm228_vm1, %v1381_v33, 16  ;;  %v1555_v16 = vcvt.s32.f32 %v427_v12  ;;  %v1567_v30 = vcvt.s32.f32 %v442_v17 }
  0xad   :  { %v1560_v27 = vsel %vm34_vm0, %v243_v29, 2147483647  ;;  %v1563_v54 = vsel %vm34_vm0, %v244_v53, 2147483647  ;;  %1187 = vpow2.f32 %v109_v28  ;;  %v119_v2 = vmul.f32 1.442695, %v1482_v32 }
  0xae   :  { %415 = vmin.xlane.f32.xlu1 %v1544_v11  ;;  %430 = vmin.xlane.f32.xlu0 %v1555_v16  ;;  %v457_v31 = vshra.s32 %v1560_v27, 16  ;;  %v472_v38 = vshra.s32 %v1563_v54, 16  ;;  %1189 = vpow2.f32 %v111_v23  ;;  %v131_v57 = vsel %vm34_vm0, %v1178_v21, 0.0 }
  0xaf   :  { %1191 = vpow2.f32 %v113_v40  ;;  %v137_v25 = vsel %vm34_vm0, %v1180_v41, 0.0  ;;  %v1263_v40 = vmov 0  }
  0xb0   :  { %v1572_v1 = vcvt.s32.f32 %v457_v31  ;;  %v1577_v37 = vcvt.s32.f32 %v472_v38  ;;  %1193 = vpow2.f32 %v115_v20  ;;  %1101 = vset.pattern.permute.xlu1 %v1263_v40  ;;  %1095 = vset.pattern.permute.xlu0 %v1263_v40  ;;  %v246_v20 = vand.u32 65535, %v1396_v44 }
  0xb1   :  { %1195 = vpow2.f32 %v117_v48  ;;  %v276_v48 = vand.u32 65535, %v1400_v46  ;;  %v291_v44 = vand.u32 65535, %v1423_v58  ;;  %v321_v58 = vand.u32 65535, %v1447_v6 }
  0xb2   :  { %445 = vmin.xlane.f32.xlu1 %v1567_v30  ;;  %460 = vmin.xlane.f32.xlu0 %v1572_v1  ;;  %1197 = vpow2.f32 %v119_v2  ;;  %v248_v41 = vcvt.s32.f32 %v246_v20  ;;  %v351_v6 = vand.u32 65535, %v1471_v22 }
  0xb3   :  { %v1182_v47 = vpop.eup %1181 }
  0xb4   :  { %v134_v24 = vsel %vm34_vm0, %v1182_v47, 0.0  ;;  %v261_v47 = vand.u32 65535, %v1416_v55 }
  0xb6   :  { %475 = vmin.xlane.f32.xlu1 %v1577_v37  ;;  %132 = vadd.xlane.f32.xlu0 %v131_v57 }
  0xb7   :  { %v1184_v13 = vpop.eup %1183 }
  0xb8   :  { %v1186_v60 = vpop.eup %1185  ;;  %v140_v14 = vsel %vm34_vm0, %v1184_v13, 0.0 }
  0xb9   :  { %v143_v32 = vsel %vm34_vm0, %v1186_v60, 0.0  ;;  %v306_v60 = vand.u32 65535, %v1439_v3  ;;  %v336_v3 = vand.u32 65535, %v1463_v15  ;;  %v366_v15 = vand.u32 65535, %v1488_v35 }
  0xba   :  { %135 = vadd.xlane.f32.xlu1 %v134_v24  ;;  %138 = vadd.xlane.f32.xlu0 %v137_v25  ;;  %v1188_v61 = vpop.eup %1187  ;;  %v263_v24 = vcvt.s32.f32 %v261_v47  ;;  %v278_v25 = vcvt.s32.f32 %v276_v48  ;;  %v381_v35 = vand.u32 65535, %v1497_v36 }
  0xbb   :  { %v1190_v0 = vpop.eup %1189  ;;  %v146_v7 = vsel %vm34_vm0, %v1188_v61, 0.0  ;;  %v368_v22 = vcvt.s32.f32 %v366_v15  ;;  %v1264_v15 = vmov 0.0  }
  0xbc   :  { %v1192_v5 = vpop.eup %1191  ;;  %v149_v12 = vsel %vm34_vm0, %v1190_v0, 0.0 }
  0xbd   :  { %v1194_v28 = vpop.eup %1193  ;;  %v152_v53 = vsel %vm34_vm0, %v1192_v5, 0.0 }
  0xbe   :  { %141 = vadd.xlane.f32.xlu1 %v140_v14  ;;  %144 = vadd.xlane.f32.xlu0 %v143_v32  ;;  %v1196_v29 = vpop.eup %1195  ;;  %v155_v17 = vsel %vm34_vm0, %v1194_v28, 0.0  ;;  %v293_v14 = vcvt.s32.f32 %v291_v44  ;;  %v308_v32 = vcvt.s32.f32 %v306_v60 }
  0xbf   :  { %v1198_v23 = vpop.eup %1197  ;;  %v158_v31 = vsel %vm34_vm0, %v1196_v29, 0.0 }
  0xc0   :  { %v161_v38 = vsel %vm34_vm0, %v1198_v23, 0.0  ;;  %v396_v23 = vand.u32 65535, %v1514_v51  ;;  %v383_v51 = vcvt.s32.f32 %v381_v35 }
  0xc2   :  { %147 = vadd.xlane.f32.xlu1 %v146_v7  ;;  %150 = vadd.xlane.f32.xlu0 %v149_v12  ;;  %v323_v7 = vcvt.s32.f32 %v321_v58  ;;  %v338_v12 = vcvt.s32.f32 %v336_v3  ;;  %v398_v40 = vcvt.s32.f32 %v396_v23 }
  0xc6   :  { %153 = vadd.xlane.f32.xlu1 %v152_v53  ;;  %156 = vadd.xlane.f32.xlu0 %v155_v17  ;;  %v353_v17 = vcvt.s32.f32 %v351_v6  ;;  %v1700_v6 = vld [vmem:[%s2124_s1 + $0x20] sm:$0xff] }
  0xca   :  { %159 = vadd.xlane.f32.xlu1 %v158_v31  ;;  %162 = vadd.xlane.f32.xlu0 %v161_v38 }
 0x11f   :  { %v1594_v21 = vpop.xlane.xlu0 %250 }
 0x120   :  { %vm252_vm2 = vcmp.eq.f32.partialorder %v1406_v50, %v1594_v21 }
 0x121   :  { %v253_v2 = vsel %vm252_vm2, %v248_v41, inf }
 0x122   :  { %254 = vmin.xlane.f32.xlu1 %v253_v2 }
 0x123   :  { %v1600_v57 = vpop.xlane.xlu1 %265  ;;  %v1602_v13 = vpop.xlane.xlu0 %280 }
 0x124   :  { %vm267_vm3 = vcmp.eq.f32.partialorder %v1429_v62, %v1600_v57  ;;  %vm282_vm4 = vcmp.eq.f32.partialorder %v1419_v56, %v1602_v13 }
 0x125   :  { %v268_v46 = vsel %vm267_vm3, %v263_v24, inf  ;;  %v283_v50 = vsel %vm282_vm4, %v278_v25, inf }
 0x126   :  { %269 = vmin.xlane.f32.xlu0 %v268_v46  ;;  %284 = vmin.xlane.f32.xlu1 %v283_v50 }
 0x127   :  { %v1610_v55 = vpop.xlane.xlu1 %295  ;;  %v1612_v61 = vpop.xlane.xlu0 %310 }
 0x128   :  { %vm297_vm5 = vcmp.eq.f32.partialorder %v1443_v4, %v1610_v55  ;;  %vm312_vm6 = vcmp.eq.f32.partialorder %v1453_v10, %v1612_v61  ;;  %v121_v4 = vmul.f32 1.442695, %v1485_v34 }
 0x129   :  { %v298_v56 = vsel %vm297_vm5, %v293_v14, inf  ;;  %v313_v62 = vsel %vm312_vm6, %v308_v32, inf  ;;  %vm505_vm5 = vcmp.ge.s32.totalorder %v1700_v6, 0 }
 0x12a   :  { %299 = vmin.xlane.f32.xlu0 %v298_v56  ;;  %314 = vmin.xlane.f32.xlu1 %v313_v62  ;;  %1199 = vpow2.f32 %v121_v4 }
 0x12b   :  { %v1620_v0 = vpop.xlane.xlu1 %325  ;;  %v1622_v5 = vpop.xlane.xlu0 %340 }
 0x12c   :  { %vm327_vm7 = vcmp.eq.f32.partialorder %v1467_v18, %v1620_v0  ;;  %vm342_vm8 = vcmp.eq.f32.partialorder %v1477_v26, %v1622_v5  ;;  %v123_v18 = vmul.f32 1.442695, %v1508_v49  ;;  %v125_v26 = vmul.f32 1.442695, %v1511_v42 }
 0x12d   :  { %v328_v10 = vsel %vm327_vm7, %v323_v7, inf  ;;  %v343_v28 = vsel %vm342_vm8, %v338_v12, inf  ;;  %v411_v49 = vand.u32 65535, %v1522_v59  ;;  %v129_v42 = vmul.f32 1.442695, %v1537_v43  ;;  %v1689_v7 = vld [vmem:[%s2124_s1 + $0x10] sm:$0xff] }
 0x12e   :  { %329 = vmin.xlane.f32.xlu0 %v328_v10  ;;  %344 = vmin.xlane.f32.xlu1 %v343_v28  ;;  %1201 = vpow2.f32 %v123_v18  ;;  %vm503_vm4 = vcmp.ge.s32.totalorder %v1689_v7, 0  ;;  %v1695_v12 = vld [vmem:[%s2124_s1 + $0x18] sm:$0xff] }
 0x12f   :  { %v1631_v29 = vpop.xlane.xlu1 %355  ;;  %v1633_v53 = vpop.xlane.xlu0 %370  ;;  %1203 = vpow2.f32 %v125_v26  ;;  %v1030_v10 = vsel %vm503_vm4, 1.0, %v1264_v15 }
 0x130   :  { %vm357_vm9 = vcmp.eq.f32.partialorder %v1493_v39, %v1631_v29  ;;  %vm372_vm10 = vcmp.eq.f32.partialorder %v1504_v45, %v1633_v53  ;;  %v426_v39 = vand.u32 65535, %v1540_v9  ;;  %v127_v45 = vmul.f32 1.442695, %v1534_v8 }
 0x131   :  { %v358_v34 = vsel %vm357_vm9, %v353_v17, inf  ;;  %v373_v31 = vsel %vm372_vm10, %v368_v22, inf  ;;  %v413_v9 = vcvt.s32.f32 %v411_v49  ;;  %v441_v8 = vand.u32 65535, %v1548_v19 }
 0x132   :  { %359 = vmin.xlane.f32.xlu0 %v358_v34  ;;  %374 = vmin.xlane.f32.xlu1 %v373_v31  ;;  %v428_v48 = vcvt.s32.f32 %v426_v39  ;;  %1205 = vpow2.f32 %v127_v45  ;;  %v1032_v22 = vsel %vm505_vm5, 1.0, %v1264_v15 }
 0x133   :  { %v1643_v38 = vpop.xlane.xlu1 %385  ;;  %v1645_v36 = vpop.xlane.xlu0 %400  ;;  %1207 = vpow2.f32 %v129_v42  ;;  %v443_v25 = vcvt.s32.f32 %v441_v8  ;;  %v257_v42 = vcvt.f32.s32 %v1594_v21  ;;  %v287_v8 = vcvt.f32.s32 %v1602_v13 }
 0x134   :  { %vm387_vm11 = vcmp.eq.f32.partialorder %v1518_v52, %v1643_v38  ;;  %vm402_vm12 = vcmp.eq.f32.partialorder %v1529_v63, %v1645_v36  ;;  %v456_v52 = vand.u32 65535, %v1560_v27  ;;  %v471_v27 = vand.u32 65535, %v1563_v54 }
 0x135   :  { %v388_v20 = vsel %vm387_vm11, %v383_v51, inf  ;;  %v403_v41 = vsel %vm402_vm12, %v398_v40, inf  ;;  %v288_v21 = vshll.u32 %v287_v8, 16 }
 0x136   :  { %389 = vmin.xlane.f32.xlu0 %v388_v20  ;;  %404 = vmin.xlane.f32.xlu1 %v403_v41  ;;  %v458_v19 = vcvt.s32.f32 %v456_v52  ;;  %v473_v46 = vcvt.s32.f32 %v471_v27  ;;  %v272_v20 = vcvt.f32.s32 %v1600_v57  ;;  %v317_v57 = vcvt.f32.s32 %v1612_v61 }
 0x137   :  { %v1655_v47 = vpop.xlane.xlu1 %415  ;;  %v1657_v59 = vpop.xlane.xlu0 %430 }
 0x138   :  { %vm417_vm13 = vcmp.eq.f32.partialorder %v1544_v11, %v1655_v47  ;;  %vm432_vm14 = vcmp.eq.f32.partialorder %v1555_v16, %v1657_v59  ;;  %v1200_v44 = vpop.eup %1199 }
 0x139   :  { %v418_v63 = vsel %vm417_vm13, %v413_v9, inf  ;;  %v433_v43 = vsel %vm432_vm14, %v428_v48, inf  ;;  %v164_v54 = vsel %vm34_vm0, %v1200_v44, 0.0  ;;  %v258_v48 = vshll.u32 %v257_v42, 16 }
 0x13a   :  { %419 = vmin.xlane.f32.xlu0 %v418_v63  ;;  %434 = vmin.xlane.f32.xlu1 %v433_v43  ;;  %v485_v63 = vld [vmem:[%s2124_s1] sm:$0xff]  ;;  %v362_v42 = vcvt.f32.s32 %v1631_v29  ;;  %v491_v29 = vld [vmem:[%s2124_s1 + $0x30] sm:$0xff] }
 0x13b   :  { %v1665_v2 = vpop.xlane.xlu1 %445  ;;  %v1667_v24 = vpop.xlane.xlu0 %460  ;;  %vm501_vm6 = vcmp.ge.s32.totalorder %v485_v63, 0 }
 0x13c   :  { %vm447_vm15 = vcmp.eq.f32.partialorder %v1567_v30, %v1665_v2  ;;  %vm462_vm1 = vcmp.eq.f32.partialorder %v1572_v1, %v1667_v24  ;;  %v1202_v50 = vpop.eup %1201 }
 0x13d   :  { %v448_v11 = vsel %vm447_vm15, %v443_v25, inf  ;;  %v463_v16 = vsel %vm462_vm1, %v458_v19, inf  ;;  %v1204_v32 = vpop.eup %1203  ;;  %v167_v1 = vsel %vm34_vm0, %v1202_v50, 0.0  ;;  %v273_v25 = vshll.u32 %v272_v20, 16 }
 0x13e   :  { %449 = vmin.xlane.f32.xlu0 %v448_v11  ;;  %464 = vmin.xlane.f32.xlu1 %v463_v16  ;;  %v170_v58 = vsel %vm34_vm0, %v1204_v32, 0.0  ;;  %v302_v19 = vcvt.f32.s32 %v1610_v55 }
 0x13f   :  { %v1674_v60 = vpop.xlane.xlu1 %475  ;;  %v1206_v30 = vpop.eup %1205 }
 0x140   :  { %vm477_vm2 = vcmp.eq.f32.partialorder %v1577_v37, %v1674_v60  ;;  %v1208_v3 = vpop.eup %1207  ;;  %v173_v56 = vsel %vm34_vm0, %v1206_v30, 0.0  ;;  %v486_v37 = vld [vmem:[%s2124_s1 + $0x8] sm:$0xff]  ;;  %v1715_v23 = vpop.xlane.xlu0 %132  ;;  %v303_v50 = vshll.u32 %v302_v19, 16  ;;  %v318_v30 = vshll.u32 %v317_v57, 16 }
 0x141   :  { %v478_v14 = vsel %vm477_vm2, %v473_v46, inf  ;;  %v176_v62 = vsel %vm34_vm0, %v1208_v3, 0.0  ;;  %vm502_vm3 = vcmp.ge.s32.totalorder %v486_v37, 0  ;;  %vm504_vm0 = vcmp.ge.s32.totalorder %v1695_v12, 0 }
 0x142   :  { %479 = vmin.xlane.f32.xlu0 %v478_v14  ;;  %165 = vadd.xlane.f32.xlu1 %v164_v54  ;;  %v1029_v4 = vsel %vm502_vm3, 1.0, %v1264_v15  ;;  %v1031_v17 = vsel %vm504_vm0, 1.0, %v1264_v15  ;;  %v332_v14 = vcvt.f32.s32 %v1620_v0  ;;  %1209 = vrcp.f32 %v1715_v23 }
 0x143   :  { %v1102_v28 = vpack.i.bf16 %v1030_v10, %v1029_v4  ;;  %v1107_v35 = vpack.i.bf16 %v1032_v22, %v1031_v17  ;;  %v1717_v18 = vpop.xlane.xlu1 %135  ;;  %v467_v17 = vcvt.f32.s32 %v1667_v24 }
 0x144   :  { %v1719_v26 = vpop.xlane.xlu0 %138  ;;  %1211 = vrcp.f32 %v1717_v18 }
 0x145   :  { %1213 = vrcp.f32 %v1719_v26 }
 0x146   :  { %168 = vadd.xlane.f32.xlu0 %v167_v1  ;;  %171 = vadd.xlane.f32.xlu1 %v170_v58  ;;  %v347_v58 = vcvt.f32.s32 %v1622_v5  ;;  %v490_v5 = vld [vmem:[%s2124_s1 + $0x28] sm:$0xff] }
 0x147   :  { %v1721_v34 = vpop.xlane.xlu1 %141  ;;  %vm506_vm2 = vcmp.ge.s32.totalorder %v490_v5, 0 }
 0x148   :  { %v1723_v31 = vpop.xlane.xlu0 %144  ;;  %1215 = vrcp.f32 %v1721_v34 }
 0x149   :  { %1217 = vrcp.f32 %v1723_v31 }
 0x14a   :  { %174 = vadd.xlane.f32.xlu0 %v173_v56  ;;  %177 = vadd.xlane.f32.xlu1 %v176_v62  ;;  %v333_v56 = vshll.u32 %v332_v14, 16 }
 0x14b   :  { %v1725_v51 = vpop.xlane.xlu1 %147 }
 0x14c   :  { %v1727_v40 = vpop.xlane.xlu0 %150  ;;  %1219 = vrcp.f32 %v1725_v51 }
 0x14d   :  { %1221 = vrcp.f32 %v1727_v40 }
 0x14f   :  { %v1729_v49 = vpop.xlane.xlu1 %153 }
 0x150   :  { %v1731_v39 = vpop.xlane.xlu0 %156 }
 0x153   :  { %v1733_v45 = vpop.xlane.xlu1 %159 }
 0x154   :  { %v1737_v41 = vpop.xlane.xlu0 %162  ;;  %1223 = vrcp.f32 %v1733_v45 }
 0x155   :  { %1225 = vrcp.f32 %v1729_v49 }
 0x156   :  { %1227 = vrcp.f32 %v1731_v39 }
 0x157   :  { %1229 = vrcp.f32 %v1737_v41 }
 0x15b   :  { %1103 = vperm.xlu1 %1101, %v1102_v28  }
 0x15f   :  { %1108 = vperm.xlu1 %1101, %v1107_v35   ;;  %v348_v35 = vshll.u32 %v347_v58, 16  ;;  %v1033_v58 = vsel %vm506_vm2, 1.0, %v1264_v15 }
 0x1ab   :  { %v255_v9 = vpop.xlane.xlu1 %254 }
 0x1ac   :  { %v256_v52 = vcvt.f32.s32 %v255_v9  ;;  %v392_v9 = vcvt.f32.s32 %v1643_v38 }
 0x1ae   :  { %v259_v43 = vadd.s32 %v258_v48, %v256_v52 }
 0x1af   :  { %v285_v27 = vpop.xlane.xlu1 %284  ;;  %v270_v11 = vpop.xlane.xlu0 %269 }
 0x1b0   :  { %v286_v16 = vcvt.f32.s32 %v285_v27  ;;  %v271_v44 = vcvt.f32.s32 %v270_v11  ;;  %vm549_vm7 = vcmp.eq.s32.totalorder %v259_v43, %v485_v63  ;;  %v363_v27 = vshll.u32 %v362_v42, 16  ;;  %v492_v63 = vld [vmem:[%s2124_s1 + $0x38] sm:$0xff] }
 0x1b1   :  { %vm565_vm8 = vmand %vm549_vm7, %vm501_vm6  ;;  %v422_v11 = vcvt.f32.s32 %v1655_v47  ;;  %vm508_vm7 = vcmp.ge.s32.totalorder %v492_v63, 0 }
 0x1b2   :  { %v289_v46 = vadd.s32 %v288_v21, %v286_v16  ;;  %v274_v13 = vadd.s32 %v273_v25, %v271_v44  ;;  %v1044_v0 = vsel %vm565_vm8, 1.0, %v1264_v15  ;;  %v407_v25 = vcvt.f32.s32 %v1645_v36 }
 0x1b3   :  { %v315_v54 = vpop.xlane.xlu1 %314  ;;  %v300_v32 = vpop.xlane.xlu0 %299  ;;  %v1028_v21 = vsel %vm501_vm6, 1.0, %v1264_v15  ;;  %v393_v16 = vshll.u32 %v392_v9, 16  ;;  %v437_v44 = vcvt.f32.s32 %v1657_v59  ;;  %v494_v59 = vld [vmem:[%s2124_s1 + $0x48] sm:$0xff] }
 0x1b4   :  { %vm550_vm9 = vcmp.eq.s32.totalorder %v274_v13, %v486_v37  ;;  %v316_v55 = vcvt.f32.s32 %v315_v54  ;;  %v301_v1 = vcvt.f32.s32 %v300_v32  ;;  %vm551_vm10 = vcmp.eq.s32.totalorder %v289_v46, %v1689_v7 }
 0x1b5   :  { %vm566_vm11 = vmand %vm550_vm9, %vm502_vm3  ;;  %v408_v54 = vshll.u32 %v407_v25, 16  ;;  %v452_v32 = vcvt.f32.s32 %v1665_v2  ;;  %vm510_vm8 = vcmp.ge.s32.totalorder %v494_v59, 0 }
 0x1b6   :  { %v319_v61 = vadd.s32 %v318_v30, %v316_v55  ;;  %v304_v3 = vadd.s32 %v303_v50, %v301_v1  ;;  %v1045_v10 = vsel %vm566_vm11, 1.0, %v1264_v15  ;;  %vm1759_vm14 = vmand %vm551_vm10, %vm503_vm4  ;;  %vm507_vm4 = vcmp.ge.s32.totalorder %v491_v29, 0 }
 0x1b7   :  { %v345_v62 = vpop.xlane.xlu1 %344  ;;  %v330_v4 = vpop.xlane.xlu0 %329  ;;  %v1096_v22 = vpack.i.bf16 %v1045_v10, %v1044_v0  ;;  %v1046_v38 = vsel %vm1759_vm14, 1.0, %v1264_v15  ;;  %v423_v55 = vshll.u32 %v422_v11, 16  ;;  %v493_v0 = vld [vmem:[%s2124_s1 + $0x40] sm:$0xff]  ;;  %v1037_v9 = vsel %vm510_vm8, 1.0, %v1264_v15 }
 0x1b8   :  { %vm553_vm12 = vcmp.eq.s32.totalorder %v319_v61, %v1700_v6  ;;  %vm552_vm13 = vcmp.eq.s32.totalorder %v304_v3, %v1695_v12  ;;  %v346_v28 = vcvt.f32.s32 %v345_v62  ;;  %v331_v37 = vcvt.f32.s32 %v330_v4 }
 0x1b9   :  { %vm568_vm15 = vmand %vm552_vm13, %vm504_vm0  ;;  %1097 = vperm.xlu0 %1095, %v1096_v22   ;;  %v377_v6 = vcvt.f32.s32 %v1633_v53  ;;  %v438_v3 = vshll.u32 %v437_v44, 16  ;;  %v482_v22 = vcvt.f32.s32 %v1674_v60  ;;  %v1034_v48 = vsel %vm507_vm4, 1.0, %v1264_v15 }
 0x1ba   :  { %v334_v20 = vadd.s32 %v333_v56, %v331_v37  ;;  %vm1769_vm1 = vmand %vm553_vm12, %vm505_vm5  ;;  %v1047_v52 = vsel %vm568_vm15, 1.0, %v1264_v15  ;;  %v349_v12 = vadd.s32 %v348_v35, %v346_v28  ;;  %v496_v28 = vld [vmem:[%s2124_s1 + $0x58] sm:$0xff]  ;;  %v453_v37 = vshll.u32 %v452_v32, 16  ;;  %v499_v56 = vld [vmem:[%s2124_s1 + $0x70] sm:$0xff] }
 0x1bb   :  { %v375_v7 = vpop.xlane.xlu1 %374  ;;  %v360_v8 = vpop.xlane.xlu0 %359  ;;  %v1112_v19 = vpack.i.bf16 %v1047_v52, %v1046_v38  ;;  %v1048_v57 = vsel %vm1769_vm1, 1.0, %v1264_v15  ;;  %v378_v14 = vshll.u32 %v377_v6, 16  ;;  %vm509_vm12 = vcmp.ge.s32.totalorder %v493_v0, 0  ;;  %v500_v38 = vld [vmem:[%s2124_s1 + $0x78] sm:$0xff] }
 0x1bc   :  { %vm554_vm3 = vcmp.eq.s32.totalorder %v334_v20, %v490_v5  ;;  %v361_v43 = vcvt.f32.s32 %v360_v8  ;;  %vm555_vm5 = vcmp.eq.s32.totalorder %v349_v12, %v491_v29  ;;  %v376_v47 = vcvt.f32.s32 %v375_v7  ;;  %v498_v20 = vld [vmem:[%s2124_s1 + $0x68] sm:$0xff]  ;;  %v495_v29 = vld [vmem:[%s2124_s1 + $0x50] sm:$0xff] }
 0x1bd   :  { %vm1790_vm0 = vmand %vm554_vm3, %vm506_vm2  ;;  %1113 = vperm.xlu1 %1101, %v1112_v19   ;;  %v1117_v30 = vpack.i.bf16 %v1028_v21, %v1048_v57  ;;  %vm512_vm14 = vcmp.ge.s32.totalorder %v496_v28, 0  ;;  %v483_v6 = vshll.u32 %v482_v22, 16  ;;  %vm514_vm2 = vcmp.ge.s32.totalorder %v498_v20, 0 }
 0x1be   :  { %v364_v13 = vadd.s32 %v363_v27, %v361_v43  ;;  %v1049_v61 = vsel %vm1790_vm0, 1.0, %v1264_v15  ;;  %vm1808_vm6 = vmand %vm555_vm5, %vm507_vm4  ;;  %v379_v10 = vadd.s32 %v378_v14, %v376_v47  ;;  %v1039_v21 = vsel %vm512_vm14, 1.0, %v1264_v15 }
 0x1bf   :  { %v405_v36 = vpop.xlane.xlu1 %404  ;;  %v390_v46 = vpop.xlane.xlu0 %389  ;;  %v1122_v35 = vpack.i.bf16 %v1033_v58, %v1049_v61  ;;  %v1050_v24 = vsel %vm1808_vm6, 1.0, %v1264_v15  ;;  %v1035_v57 = vsel %vm508_vm7, 1.0, %v1264_v15  ;;  %vm511_vm0 = vcmp.ge.s32.totalorder %v495_v29, 0 }
 0x1c0   :  { %v391_v50 = vcvt.f32.s32 %v390_v46  ;;  %v406_v62 = vcvt.f32.s32 %v405_v36  ;;  %vm556_vm9 = vcmp.eq.s32.totalorder %v364_v13, %v492_v63  ;;  %vm557_vm15 = vcmp.eq.s32.totalorder %v379_v10, %v493_v0  ;;  %v497_v46 = vld [vmem:[%s2124_s1 + $0x60] sm:$0xff]  ;;  %s1265_s1 = smov [#allocation2]  }
 0x1c1   :  { %1118 = vperm.xlu1 %1101, %v1117_v30   ;;  %vm1833_vm13 = vmand %vm556_vm9, %vm508_vm7  ;;  %v1127_v27 = vpack.i.bf16 %v1034_v48, %v1050_v24  ;;  %vm516_vm6 = vcmp.ge.s32.totalorder %v500_v38, 0  ;;  %v1041_v14 = vsel %vm514_vm2, 1.0, %v1264_v15  ;;  %v1036_v30 = vsel %vm509_vm12, 1.0, %v1264_v15  ;;  %s1020_s15 = sshll.u32 %s1265_s1, 4  ;;  %s1021_s15 = int_to_ptr.vmem [resolvable:$true] %s1020_s15 }
 0x1c2   :  { %v394_v1 = vadd.s32 %v393_v16, %v391_v50  ;;  %v409_v7 = vadd.s32 %v408_v54, %v406_v62  ;;  %v1051_v16 = vsel %vm1833_vm13, 1.0, %v1264_v15  ;;  %vm1854_vm4 = vmand %vm557_vm15, %vm509_vm12  ;;  %v468_v54 = vshll.u32 %v467_v17, 16  ;;  %s1241_s16 = scalar_lea.vmem %s1021_s15, 32  ;;  %p1246_p1 = scmp.lt.s32.totalorder %s1021_s15, %s1021_s15 }
 0x1c3   :  { %v435_v2 = vpop.xlane.xlu1 %434  ;;  %v420_v4 = vpop.xlane.xlu0 %419  ;;  %v1132_v50 = vpack.i.bf16 %v1035_v57, %v1051_v16  ;;  %v1043_v58 = vsel %vm516_vm6, 1.0, %v1264_v15  ;;  %vm515_vm15 = vcmp.ge.s32.totalorder %v499_v56, 0  ;;  %p1242_p0 = scmp.ne.s32.totalorder %s1021_s15, %s1241_s16  ;;  %p1247_p2 = scmp.lt.s32.totalorder %s1241_s16, %s1241_s16 }
 0x1c4   :  { %vm558_vm10 = vcmp.eq.s32.totalorder %v394_v1, %v494_v59  ;;  %v421_v5 = vcvt.f32.s32 %v420_v4  ;;  %v436_v12 = vcvt.f32.s32 %v435_v2  ;;  %vm559_vm5 = vcmp.eq.s32.totalorder %v409_v7, %v495_v29 }
 0x1c5   :  { %vm574_vm11 = vmand %vm558_vm10, %vm510_vm8  ;;  %1123 = vperm.xlu1 %1101, %v1122_v35   ;;  %vm513_vm10 = vcmp.ge.s32.totalorder %v497_v46, 0  ;;  %v1038_v4 = vsel %vm511_vm0, 1.0, %v1264_v15  ;;  %v1042_v22 = vsel %vm515_vm15, 1.0, %v1264_v15  ;;  %p1248_p3 = por %p1247_p2, %p1246_p1 }
 0x1c6   :  { %v424_v42 = vadd.s32 %v423_v55, %v421_v5  ;;  %v1053_v52 = vsel %vm574_vm11, 1.0, %v1264_v15  ;;  %v439_v47 = vadd.s32 %v438_v3, %v436_v12  ;;  %v1052_v55 = vsel %vm1854_vm4, 1.0, %v1264_v15  ;;  %vm575_vm9 = vmand %vm559_vm5, %vm511_vm0 }
 0x1c7   :  { %v450_v8 = vpop.xlane.xlu0 %449  ;;  %v465_v25 = vpop.xlane.xlu1 %464  ;;  %v1142_v19 = vpack.i.bf16 %v1037_v9, %v1053_v52  ;;  %v1137_v62 = vpack.i.bf16 %v1036_v30, %v1052_v55  ;;  %v1054_v0 = vsel %vm575_vm9, 1.0, %v1264_v15  ;;  %v1040_v5 = vsel %vm513_vm10, 1.0, %v1264_v15  ;;  %p1249_p4 = pnand %p1248_p3, %p1242_p0 }
 0x1c8   :  { %vm560_vm1 = vcmp.eq.s32.totalorder %v424_v42, %v496_v28  ;;  %v451_v43 = vcvt.f32.s32 %v450_v8  ;;  %v466_v63 = vcvt.f32.s32 %v465_v25  ;;  %vm561_vm11 = vcmp.eq.s32.totalorder %v439_v47, %v497_v46 }
 0x1c9   :  { %vm576_vm3 = vmand %vm560_vm1, %vm512_vm14  ;;  %1143 = vperm.xlu0 %1095, %v1142_v19   ;;  %1128 = vperm.xlu1 %1101, %v1127_v27   ;;  %v1147_v28 = vpack.i.bf16 %v1038_v4, %v1054_v0 }
 0x1ca   :  { %v454_v11 = vadd.s32 %v453_v37, %v451_v43  ;;  %v1055_v36 = vsel %vm576_vm3, 1.0, %v1264_v15  ;;  %v469_v61 = vadd.s32 %v468_v54, %v466_v63  ;;  %vm577_vm14 = vmand %vm561_vm11, %vm513_vm10  ;;  %vm16_vm3 = vcmask 115712  }
 0x1cb   :  { %v480_v53 = vpop.xlane.xlu0 %479  ;;  %v1152_v59 = vpack.i.bf16 %v1039_v21, %v1055_v36  ;;  %v1056_v37 = vsel %vm577_vm14, 1.0, %v1264_v15  ;;  %17 = vst.msk [vmem:[#allocation2] sm:$0x3] %vm16_vm3, %v1264_v15  ;;  %v166_v51 = vpop.xlane.xlu1 %165 }
 0x1cc   :  { %vm562_vm7 = vcmp.eq.s32.totalorder %v454_v11, %v498_v20  ;;  %v481_v13 = vcvt.f32.s32 %v480_v53  ;;  %vm563_vm1 = vcmp.eq.s32.totalorder %v469_v61, %v499_v56  ;;  %v1157_v17 = vpack.i.bf16 %v1040_v5, %v1056_v37  ;;  %v1210_v20 = vpop.eup %1209 }
 0x1cd   :  { %vm578_vm8 = vmand %vm562_vm7, %vm514_vm2  ;;  %1153 = vperm.xlu0 %1095, %v1152_v59   ;;  %1133 = vperm.xlu1 %1101, %v1132_v50   ;;  %v1212_v9 = vpop.eup %1211  ;;  %1231 = vrcp.f32 %v166_v51 }
 0x1ce   :  { %v484_v32 = vadd.s32 %v483_v6, %v481_v13  ;;  %v1057_v1 = vsel %vm578_vm8, 1.0, %v1264_v15  ;;  %vm579_vm2 = vmand %vm563_vm1, %vm515_vm15  ;;  %v1214_v23 = vpop.eup %1213  ;;  %v614_v34 = vmul.f32 15.0, %v1212_v9 }
 0x1cf   :  { %v1162_v3 = vpack.i.bf16 %v1041_v14, %v1057_v1  ;;  %v1058_v35 = vsel %vm579_vm2, 1.0, %v1264_v15  ;;  %v1216_v18 = vpop.eup %1215  ;;  %v615_v48 = vmul.f32 15.0, %v1214_v23  ;;  %v172_v41 = vpop.xlane.xlu1 %171 }
 0x1d0   :  { %vm564_vm13 = vcmp.eq.s32.totalorder %v484_v32, %v500_v38  ;;  %v1167_v42 = vpack.i.bf16 %v1042_v22, %v1058_v35  ;;  %v1218_v31 = vpop.eup %1217  ;;  %v616_v24 = vmul.f32 15.0, %v1216_v18  ;;  %v630_v45 = vfloor.f32 %v614_v34  ;;  %v169_v21 = vpop.xlane.xlu0 %168 }
 0x1d1   :  { %vm580_vm12 = vmand %vm564_vm13, %vm516_vm6  ;;  %1163 = vperm.xlu0 %1095, %v1162_v3   ;;  %1138 = vperm.xlu1 %1101, %v1137_v62   ;;  %v1220_v40 = vpop.eup %1219  ;;  %v617_v8 = vmul.f32 15.0, %v1218_v31  ;;  %v631_v52 = vfloor.f32 %v615_v48  ;;  %1233 = vrcp.f32 %v172_v41 }
 0x1d2   :  { %v1059_v2 = vsel %vm580_vm12, 1.0, %v1264_v15  ;;  %v613_v15 = vmul.f32 15.0, %v1210_v20  ;;  %v1222_v7 = vpop.eup %1221  ;;  %v632_v12 = vfloor.f32 %v616_v24  ;;  %v618_v39 = vmul.f32 15.0, %v1220_v40 }
 0x1d3   :  { %v1172_v10 = vpack.i.bf16 %v1043_v58, %v1059_v2  ;;  %v1224_v49 = vpop.eup %1223  ;;  %v619_v38 = vmul.f32 15.0, %v1222_v7  ;;  %v1062_v6 = vtrunc.f32 %v630_v45  ;;  %v633_v25 = vfloor.f32 %v617_v8  ;;  %v178_v54 = vpop.xlane.xlu1 %177 }
 0x1d4   :  { %v629_v26 = vfloor.f32 %v613_v15  ;;  %v1226_v29 = vpop.eup %1225  ;;  %v622_v19 = vmul.f32 15.0, %v1224_v49  ;;  %v1064_v27 = vtrunc.f32 %v631_v52  ;;  %v1066_v16 = vtrunc.f32 %v632_v12  ;;  %v175_v58 = vpop.xlane.xlu0 %174 }
 0x1d5   :  { %1173 = vperm.xlu0 %1095, %v1172_v10   ;;  %1148 = vperm.xlu1 %1101, %v1147_v28   ;;  %v620_v11 = vmul.f32 15.0, %v1226_v29  ;;  %v1228_v57 = vpop.eup %1227  ;;  %v634_v44 = vfloor.f32 %v618_v39  ;;  %v635_v46 = vfloor.f32 %v619_v38  ;;  %v1063_v47 = vcvt.f32.s32 %v1062_v6 }
 0x1d6   :  { %v1060_v60 = vtrunc.f32 %v629_v26  ;;  %v1230_v53 = vpop.eup %1229  ;;  %v1068_v63 = vtrunc.f32 %v633_v25  ;;  %v638_v13 = vfloor.f32 %v622_v19  ;;  %1235 = vrcp.f32 %v169_v21 }
 0x1d7   :  { %v1065_v59 = vcvt.f32.s32 %v1064_v27  ;;  %v636_v50 = vfloor.f32 %v620_v11  ;;  %v621_v14 = vmul.f32 15.0, %v1228_v57  ;;  %v1067_v32 = vcvt.f32.s32 %v1066_v16  ;;  %v1104_v45 = vpop.permute.xlu1 %1103 }
 0x1d8   :  { %v1061_v43 = vcvt.f32.s32 %v1060_v60  ;;  %v1070_v30 = vtrunc.f32 %v634_v44  ;;  %v623_v55 = vmul.f32 15.0, %v1230_v53  ;;  %v1072_v1 = vtrunc.f32 %v635_v46 }
 0x1d9   :  { %1158 = vperm.xlu1 %1101, %v1157_v17   ;;  %vm663_vm0 = vcmp.gt.s32.totalorder %v1063_v47, 0  ;;  %v1069_v3 = vcvt.f32.s32 %v1068_v63  ;;  %v1078_v56 = vtrunc.f32 %v638_v13  ;;  %1237 = vrcp.f32 %v178_v54 }
 0x1da   :  { %vm1902_vm4 = vcmp.gt.s32.totalorder %v1061_v43, 0  ;;  %vm665_vm5 = vcmp.gt.s32.totalorder %v1065_v59, 0  ;;  %v1074_v62 = vtrunc.f32 %v636_v50  ;;  %v637_v2 = vfloor.f32 %v621_v14  ;;  %v1232_v5 = vpop.eup %1231 }
 0x1db   :  { %v662_v61 = vsel %vm1902_vm4, %v1061_v43, 0  ;;  %vm667_vm6 = vcmp.gt.s32.totalorder %v1067_v32, 0  ;;  %v1071_v4 = vcvt.f32.s32 %v1070_v30  ;;  %v639_v0 = vfloor.f32 %v623_v55  ;;  %v1951_v44 = vpop.permute.xlu1 %1108 }
 0x1dc   :  { %1239 = vrcp.f32 %v175_v58  ;;  %v1073_v10 = vcvt.f32.s32 %v1072_v1  ;;  %v664_v28 = vsel %vm663_vm0, %v1063_v47, 0  ;;  %vm693_vm7 = vcmp.lt.s32.totalorder %v662_v61, 14 }
 0x1dd   :  { %1168 = vperm.xlu1 %1101, %v1167_v42   ;;  %vm669_vm8 = vcmp.gt.s32.totalorder %v1069_v3, 0  ;;  %v1079_v37 = vcvt.f32.s32 %v1078_v56  ;;  %v666_v17 = vsel %vm665_vm5, %v1065_v59, 0  ;;  %v1075_v22 = vcvt.f32.s32 %v1074_v62 }
 0x1de   :  { %v1076_v35 = vtrunc.f32 %v637_v2  ;;  %v668_v42 = vsel %vm667_vm6, %v1067_v32, 0  ;;  %vm671_vm9 = vcmp.gt.s32.totalorder %v1071_v4, 0  ;;  %v1080_v20 = vtrunc.f32 %v639_v0  ;;  %v1234_v26 = vpop.eup %1233 }
 0x1df   :  { %vm695_vm10 = vcmp.lt.s32.totalorder %v664_v28, 14  ;;  %v1908_v15 = vsel %vm693_vm7, %v662_v61, 14  ;;  %vm1910_vm11 = vcmp.gt.s32.totalorder %v1073_v10, 0  ;;  %v624_v23 = vmul.f32 15.0, %v1232_v5 }
 0x1e0   :  { %vm697_vm13 = vcmp.lt.s32.totalorder %v666_v17, 14  ;;  %v670_v18 = vsel %vm669_vm8, %v1069_v3, 0  ;;  %vm1914_vm12 = vcmp.gt.s32.totalorder %v1079_v37, 0  ;;  %vm699_vm14 = vcmp.lt.s32.totalorder %v668_v42, 14 }
 0x1e1   :  { %vm1918_vm15 = vcmp.gt.s32.totalorder %v1075_v22, 0  ;;  %v1077_v51 = vcvt.f32.s32 %v1076_v35  ;;  %v696_v24 = vsel %vm695_vm10, %v664_v28, 14  ;;  %v672_v40 = vsel %vm671_vm9, %v1071_v4, 0 }
 0x1e2   :  { %v1081_v60 = vcvt.f32.s32 %v1080_v20  ;;  %v1922_v7 = vsel %vm697_vm13, %v666_v17, 14  ;;  %vm701_vm1 = vcmp.lt.s32.totalorder %v670_v18, 14  ;;  %vm725_vm2 = vcmp.eq.s32.totalorder %v1908_v15, %v1381_v33 }
 0x1e3   :  { %v1236_v31 = vpop.eup %1235  ;;  %v674_v8 = vsel %vm1910_vm11, %v1073_v10, 0  ;;  %v640_v49 = vfloor.f32 %v624_v23  ;;  %v626_v52 = vmul.f32 15.0, %v1234_v26  ;;  %v1928_v29 = vsel %vm699_vm14, %v668_v42, 14 }
 0x1e4   :  { %v680_v12 = vsel %vm1914_vm12, %v1079_v37, 0  ;;  %v625_v39 = vmul.f32 15.0, %v1236_v31  ;;  %vm726_vm4 = vcmp.eq.s32.totalorder %v696_v24, %v1381_v33  ;;  %vm703_vm0 = vcmp.lt.s32.totalorder %v672_v40, 14 }
 0x1e5   :  { %v676_v43 = vsel %vm1918_vm15, %v1075_v22, 0  ;;  %vm1935_vm5 = vcmp.gt.s32.totalorder %v1077_v51, 0  ;;  %vm727_vm6 = vcmp.eq.s32.totalorder %v1922_v7, %v1381_v33  ;;  %v1941_v6 = vsel %vm701_vm1, %v670_v18, 14 }
 0x1e6   :  { %v1238_v38 = vpop.eup %1237  ;;  %vm705_vm7 = vcmp.lt.s32.totalorder %v674_v8, 14  ;;  %vm1943_vm8 = vcmp.gt.s32.totalorder %v1081_v60, 0  ;;  %vm837_vm9 = vcmask 121856   ;;  %vm728_vm10 = vcmp.eq.s32.totalorder %v1928_v29, %v1381_v33 }
 0x1e7   :  { %vm711_vm11 = vcmp.lt.s32.totalorder %v680_v12, 14  ;;  %v1082_v27 = vtrunc.f32 %v640_v49  ;;  %v642_v11 = vfloor.f32 %v626_v52  ;;  %v1949_v21 = vsel %vm703_vm0, %v672_v40, 14 }
 0x1e8   :  { %vm707_vm13 = vcmp.lt.s32.totalorder %v676_v43, 14  ;;  %v641_v57 = vfloor.f32 %v625_v39  ;;  %v628_v16 = vmul.f32 15.0, %v1238_v38  ;;  %v1953_v36 = vsel %vm705_vm7, %v674_v8, 14 }
 0x1e9   :  { %v1240_v19 = vpop.eup %1239  ;;  %v678_v46 = vsel %vm1935_vm5, %v1077_v51, 0  ;;  %v1105_v47 = vunpack.i.l.bf16 %v1104_v45  ;;  %v1957_v59 = vsel %vm711_vm11, %v680_v12, 14  ;;  %v1106_v14 = vunpack.i.h.bf16 %v1104_v45 }
 0x1ea   :  { %v627_v50 = vmul.f32 15.0, %v1240_v19  ;;  %vm729_vm12 = vcmp.eq.s32.totalorder %v1941_v6, %v1381_v33  ;;  %v1961_v54 = vsel %vm707_vm13, %v676_v43, 14  ;;  %v682_v32 = vsel %vm1943_vm8, %v1081_v60, 0 }
 0x1eb   :  { %v1083_v30 = vcvt.f32.s32 %v1082_v27  ;;  %v1965_v55 = vtrunc.f32 %v642_v11  ;;  %vm709_vm14 = vcmp.lt.s32.totalorder %v678_v46, 14  ;;  %v1084_v61 = vtrunc.f32 %v641_v57 }
 0x1ec   :  { %v644_v3 = vfloor.f32 %v628_v16  ;;  %v956_v4 = vsel %vm726_vm4, %v1105_v47, 0.0  ;;  %v643_v5 = vfloor.f32 %v627_v50  ;;  %v957_v37 = vsel %vm727_vm6, %v1106_v14, 0.0 }
 0x1ed   :  { %v1110_v17 = vunpack.i.l.bf16 %v1951_v44  ;;  %vm730_vm15 = vcmp.eq.s32.totalorder %v1949_v21, %v1381_v33  ;;  %vm713_vm1 = vcmp.lt.s32.totalorder %v682_v32, 14  ;;  %vm1982_vm0 = vcmp.gt.s32.totalorder %v1083_v30, 0 }
 0x1ee   :  { %v1087_v35 = vcvt.f32.s32 %v1965_v55  ;;  %v1085_v9 = vcvt.f32.s32 %v1084_v61  ;;  %v1090_v23 = vtrunc.f32 %v644_v3  ;;  %v972_v18 = vsel %vm837_vm9, %v956_v4, 0.0 }
 0x1ef   :  { %v1111_v31 = vunpack.i.h.bf16 %v1951_v44  ;;  %v1088_v40 = vtrunc.f32 %v643_v5  ;;  %v958_v60 = vsel %vm728_vm10, %v1110_v17, 0.0  ;;  %v684_v45 = vsel %vm1982_vm0, %v1083_v30, 0 }
 0x1f0   :  { %vm731_vm5 = vcmp.eq.s32.totalorder %v1953_v36, %v1381_v33  ;;  %v1091_v39 = vcvt.f32.s32 %v1090_v23  ;;  %v974_v57 = vsel %vm837_vm9, %v957_v37, 0.0  ;;  %v2022_v16 = vsel %vm709_vm14, %v678_v46, 14 }
 0x1f1   :  { %v1089_v11 = vcvt.f32.s32 %v1088_v40  ;;  %v2025_v44 = vsel %vm713_vm1, %v682_v32, 14  ;;  %v976_v47 = vsel %vm837_vm9, %v958_v60, 0.0  ;;  %vm734_vm7 = vcmp.eq.s32.totalorder %v1957_v59, %v1381_v33 }
 0x1f2   :  { %vm715_vm8 = vcmp.lt.s32.totalorder %v684_v45, 14  ;;  %vm735_vm1 = vcmp.eq.s32.totalorder %v2025_v44, %v1381_v33 }
 0x1f3   :  { %vm689_vm11 = vcmp.gt.s32.totalorder %v1089_v11, 0 }
 0x1f4   :  { %v690_v22 = vsel %vm689_vm11, %v1089_v11, 0 }
 0x1f5   :  { %vm721_vm0 = vcmp.lt.s32.totalorder %v690_v22, 14 }
 0x234   :  { %v1098_v53 = vpop.permute.xlu0 %1097 }
 0x235   :  { %v1100_v63 = vunpack.i.h.bf16 %v1098_v53  ;;  %v1099_v13 = vunpack.i.l.bf16 %v1098_v53  ;;  %v959_v53 = vsel %vm729_vm12, %v1111_v31, 0.0 }
 0x237   :  { %v822_v1 = vsel %vm726_vm4, %v1100_v63, 0.0  ;;  %v821_v58 = vsel %vm725_vm2, %v1099_v13, 0.0  ;;  %vm2002_vm4 = vcmp.gt.s32.totalorder %v1087_v35, 0 }
 0x238   :  { %v839_v56 = vsel %vm837_vm9, %v822_v1, 0.0  ;;  %v838_v62 = vsel %vm837_vm9, %v821_v58, 0.0  ;;  %v1114_v2 = vpop.permute.xlu1 %1113  ;;  %v688_v6 = vsel %vm2002_vm4, %v1087_v35, 0  ;;  %v978_v58 = vsel %vm837_vm9, %v959_v53, 0.0 }
 0x239   :  { %v840_v0 = vadd.f32 %v839_v56, %v838_v62  ;;  %v1116_v10 = vunpack.i.h.bf16 %v1114_v2  ;;  %v1115_v28 = vunpack.i.l.bf16 %v1114_v2  ;;  %v716_v62 = vsel %vm715_vm8, %v684_v45, 14 }
 0x23a   :  { %vm719_vm13 = vcmp.lt.s32.totalorder %v688_v6, 14  ;;  %vm736_vm4 = vcmp.eq.s32.totalorder %v716_v62, %v1381_v33  ;;  %vm1009_vm8 = vcmask 1040384  }
 0x23b   :  { %v824_v42 = vsel %vm728_vm10, %v1116_v10, 0.0  ;;  %v823_v20 = vsel %vm727_vm6, %v1115_v28, 0.0  ;;  %vm2014_vm6 = vcmp.gt.s32.totalorder %v1085_v9, 0  ;;  %vm691_vm10 = vcmp.gt.s32.totalorder %v1091_v39, 0 }
 0x23c   :  { %v841_v26 = vsel %vm837_vm9, %v823_v20, 0.0  ;;  %v1119_v34 = vpop.permute.xlu1 %1118  ;;  %v843_v7 = vsel %vm837_vm9, %v824_v42, 0.0  ;;  %v686_v32 = vsel %vm2014_vm6, %v1085_v9, 0  ;;  %v692_v28 = vsel %vm691_vm10, %v1091_v39, 0 }
 0x23d   :  { %v842_v48 = vadd.f32 %v841_v26, %v840_v0  ;;  %v1121_v51 = vunpack.i.h.bf16 %v1119_v34  ;;  %v1120_v24 = vunpack.i.l.bf16 %v1119_v34  ;;  %vm717_vm14 = vcmp.lt.s32.totalorder %v686_v32, 14 }
 0x23e   :  { %v718_v36 = vsel %vm717_vm14, %v686_v32, 14 }
 0x23f   :  { %v844_v49 = vadd.f32 %v843_v7, %v842_v48  ;;  %v955_v52 = vsel %vm725_vm2, %v1121_v51, 0.0  ;;  %v825_v12 = vsel %vm729_vm12, %v1120_v24, 0.0  ;;  %vm732_vm2 = vcmp.eq.s32.totalorder %v1961_v54, %v1381_v33 }
 0x240   :  { %v971_v43 = vsel %vm837_vm9, %v955_v52, 0.0  ;;  %v845_v38 = vsel %vm837_vm9, %v825_v12, 0.0  ;;  %v1124_v41 = vpop.permute.xlu1 %1123  ;;  %vm733_vm12 = vcmp.eq.s32.totalorder %v2022_v16, %v1381_v33  ;;  %vm737_vm6 = vcmp.eq.s32.totalorder %v718_v36, %v1381_v33 }
 0x241   :  { %v973_v25 = vadd.f32 %v972_v18, %v971_v43  ;;  %v846_v15 = vadd.f32 %v845_v38, %v844_v49  ;;  %v1126_v19 = vunpack.i.h.bf16 %v1124_v41  ;;  %v1125_v27 = vunpack.i.l.bf16 %v1124_v41 }
 0x242   :  { %v720_v18 = vsel %vm719_vm13, %v688_v6, 14  ;;  %v722_v38 = vsel %vm721_vm0, %v690_v22, 14 }
 0x243   :  { %v975_v63 = vadd.f32 %v974_v57, %v973_v25  ;;  %v826_v13 = vsel %vm730_vm15, %v1125_v27, 0.0  ;;  %v960_v30 = vsel %vm730_vm15, %v1126_v19, 0.0  ;;  %vm723_vm15 = vcmp.lt.s32.totalorder %v692_v28, 14 }
 0x244   :  { %v847_v46 = vsel %vm837_vm9, %v826_v13, 0.0  ;;  %v1144_v50 = vpop.permute.xlu0 %1143  ;;  %v1129_v14 = vpop.permute.xlu1 %1128  ;;  %v980_v2 = vsel %vm837_vm9, %v960_v30, 0.0  ;;  %v724_v39 = vsel %vm723_vm15, %v692_v28, 14 }
 0x245   :  { %v848_v55 = vadd.f32 %v847_v46, %v846_v15  ;;  %v977_v1 = vadd.f32 %v976_v47, %v975_v63  ;;  %v1131_v61 = vunpack.i.h.bf16 %v1129_v14  ;;  %v1130_v3 = vunpack.i.l.bf16 %v1129_v14 }
 0x246   :  { %v1146_v37 = vunpack.i.h.bf16 %v1144_v50  ;;  %v1145_v26 = vunpack.i.l.bf16 %v1144_v50 }
 0x247   :  { %v979_v56 = vadd.f32 %v978_v58, %v977_v1  ;;  %v961_v21 = vsel %vm731_vm5, %v1131_v61, 0.0  ;;  %v827_v4 = vsel %vm731_vm5, %v1130_v3, 0.0  ;;  %vm738_vm5 = vcmp.eq.s32.totalorder %v720_v18, %v1381_v33 }
 0x248   :  { %v1154_v0 = vpop.permute.xlu0 %1153  ;;  %v1134_v10 = vpop.permute.xlu1 %1133  ;;  %v849_v17 = vsel %vm837_vm9, %v827_v4, 0.0  ;;  %v982_v35 = vsel %vm837_vm9, %v961_v21, 0.0  ;;  %v964_v51 = vsel %vm734_vm7, %v1146_v37, 0.0  ;;  %v830_v12 = vsel %vm734_vm7, %v1145_v26, 0.0 }
 0x249   :  { %v981_v5 = vadd.f32 %v980_v2, %v979_v56  ;;  %v850_v42 = vadd.f32 %v849_v17, %v848_v55  ;;  %v1136_v20 = vunpack.i.h.bf16 %v1134_v10  ;;  %v1135_v9 = vunpack.i.l.bf16 %v1134_v10 }
 0x24a   :  { %v1156_v24 = vunpack.i.h.bf16 %v1154_v0  ;;  %v1155_v7 = vunpack.i.l.bf16 %v1154_v0  ;;  %v988_v41 = vsel %vm837_vm9, %v964_v51, 0.0  ;;  %v855_v46 = vsel %vm837_vm9, %v830_v12, 0.0 }
 0x24b   :  { %v983_v23 = vadd.f32 %v982_v35, %v981_v5  ;;  %v962_v34 = vsel %vm732_vm2, %v1136_v20, 0.0  ;;  %v828_v31 = vsel %vm732_vm2, %v1135_v9, 0.0  ;;  %vm740_vm2 = vcmp.eq.s32.totalorder %v724_v39, %v1381_v33 }
 0x24c   :  { %v1139_v48 = vpop.permute.xlu1 %1138  ;;  %v984_v40 = vsel %vm837_vm9, %v962_v34, 0.0  ;;  %v851_v60 = vsel %vm837_vm9, %v828_v31, 0.0  ;;  %v1164_v49 = vpop.permute.xlu0 %1163  ;;  %v966_v25 = vsel %vm736_vm4, %v1156_v24, 0.0  ;;  %v832_v59 = vsel %vm736_vm4, %v1155_v7, 0.0 }
 0x24d   :  { %v852_v45 = vadd.f32 %v851_v60, %v850_v42  ;;  %v985_v8 = vadd.f32 %v984_v40, %v983_v23  ;;  %v1141_v52 = vunpack.i.h.bf16 %v1139_v48  ;;  %v1140_v54 = vunpack.i.l.bf16 %v1139_v48 }
 0x24e   :  { %v1166_v53 = vunpack.i.h.bf16 %v1164_v49  ;;  %v1165_v47 = vunpack.i.l.bf16 %v1164_v49  ;;  %v992_v50 = vsel %vm837_vm9, %v966_v25, 0.0  ;;  %v859_v30 = vsel %vm837_vm9, %v832_v59, 0.0 }
 0x24f   :  { %v963_v29 = vsel %vm733_vm12, %v1141_v52, 0.0  ;;  %v829_v19 = vsel %vm733_vm12, %v1140_v54, 0.0  ;;  %vm739_vm7 = vcmp.eq.s32.totalorder %v722_v38, %v1381_v33 }
 0x250   :  { %v1149_v43 = vpop.permute.xlu1 %1148  ;;  %v986_v15 = vsel %vm837_vm9, %v963_v29, 0.0  ;;  %v853_v27 = vsel %vm837_vm9, %v829_v19, 0.0  ;;  %v1174_v14 = vpop.permute.xlu0 %1173  ;;  %v968_v2 = vsel %vm738_vm5, %v1166_v53, 0.0  ;;  %v834_v21 = vsel %vm738_vm5, %v1165_v47, 0.0 }
 0x251   :  { %v987_v11 = vadd.f32 %v986_v15, %v985_v8  ;;  %v1151_v57 = vunpack.i.h.bf16 %v1149_v43  ;;  %v854_v63 = vadd.f32 %v853_v27, %v852_v45  ;;  %v1150_v13 = vunpack.i.l.bf16 %v1149_v43 }
 0x252   :  { %v1176_v4 = vunpack.i.h.bf16 %v1174_v14  ;;  %v1175_v10 = vunpack.i.l.bf16 %v1174_v14  ;;  %v996_v23 = vsel %vm837_vm9, %v968_v2, 0.0  ;;  %v863_v18 = vsel %vm837_vm9, %v834_v21, 0.0 }
 0x253   :  { %v965_v6 = vsel %vm735_vm1, %v1151_v57, 0.0  ;;  %v989_v16 = vadd.f32 %v988_v41, %v987_v11  ;;  %v831_v1 = vsel %vm735_vm1, %v1150_v13, 0.0  ;;  %v856_v58 = vadd.f32 %v855_v46, %v854_v63  ;;  %v1008_v11 = vld [vmem:[#allocation2] sm:$0x3] }
 0x254   :  { %v1159_v32 = vpop.permute.xlu1 %1158  ;;  %v990_v55 = vsel %vm837_vm9, %v965_v6, 0.0  ;;  %v857_v61 = vsel %vm837_vm9, %v831_v1, 0.0  ;;  %v970_v34 = vsel %vm740_vm2, %v1176_v4, 0.0  ;;  %v836_v24 = vsel %vm740_vm2, %v1175_v10, 0.0 }
 0x255   :  { %v991_v3 = vadd.f32 %v990_v55, %v989_v16  ;;  %v1161_v56 = vunpack.i.h.bf16 %v1159_v32  ;;  %v1160_v62 = vunpack.i.l.bf16 %v1159_v32  ;;  %v858_v0 = vadd.f32 %v857_v61, %v856_v58 }
 0x256   :  { %v1000_v45 = vsel %vm837_vm9, %v970_v34, 0.0  ;;  %v867_v8 = vsel %vm837_vm9, %v836_v24, 0.0 }
 0x257   :  { %v967_v28 = vsel %vm737_vm6, %v1161_v56, 0.0  ;;  %v833_v44 = vsel %vm737_vm6, %v1160_v62, 0.0  ;;  %v993_v5 = vadd.f32 %v992_v50, %v991_v3  ;;  %v860_v22 = vadd.f32 %v859_v30, %v858_v0 }
 0x258   :  { %v1169_v37 = vpop.permute.xlu1 %1168  ;;  %v994_v17 = vsel %vm837_vm9, %v967_v28, 0.0  ;;  %v861_v35 = vsel %vm837_vm9, %v833_v44, 0.0 }
 0x259   :  { %v1171_v42 = vunpack.i.h.bf16 %v1169_v37  ;;  %v995_v20 = vadd.f32 %v994_v17, %v993_v5  ;;  %v1170_v9 = vunpack.i.l.bf16 %v1169_v37  ;;  %v862_v36 = vadd.f32 %v861_v35, %v860_v22 }
 0x25b   :  { %v969_v26 = vsel %vm739_vm7, %v1171_v42, 0.0  ;;  %v835_v48 = vsel %vm739_vm7, %v1170_v9, 0.0  ;;  %v997_v51 = vadd.f32 %v996_v23, %v995_v20  ;;  %v864_v40 = vadd.f32 %v863_v18, %v862_v36 }
 0x25c   :  { %v998_v31 = vsel %vm837_vm9, %v969_v26, 0.0  ;;  %v865_v60 = vsel %vm837_vm9, %v835_v48, 0.0 }
 0x25d   :  { %v999_v7 = vadd.f32 %v998_v31, %v997_v51  ;;  %v866_v33 = vadd.f32 %v865_v60, %v864_v40 }
 0x25f   :  { %v1001_v49 = vadd.f32 %v1000_v45, %v999_v7  ;;  %v868_v52 = vadd.f32 %v867_v8, %v866_v33 }
 0x261   :  { %v1002_v54 = vrot.slane %v1001_v49, 4  ;;  %v869_v12 = vrot.slane %v868_v52, 4 }
 0x263   :  { %v1003_v29 = vadd.f32 %v1002_v54, %v1001_v49  ;;  %v870_v39 = vadd.f32 %v869_v12, %v868_v52 }
 0x265   :  { %v1004_v43 = vrot.slane %v1003_v29, 2  ;;  %v871_v38 = vrot.slane %v870_v39, 2 }
 0x267   :  { %v1005_v41 = vadd.f32 %v1004_v43, %v1003_v29  ;;  %v872_v25 = vadd.f32 %v871_v38, %v870_v39 }
 0x269   :  { %v1006_v15 = vrot.slane %v1005_v41, 1  ;;  %v873_v19 = vrot.slane %v872_v25, 1 }
 0x26b   :  { %v1007_v59 = vadd.f32 %v1006_v15, %v1005_v41  ;;  %v874_v27 = vadd.f32 %v873_v19, %v872_v25 }
 0x26d   :  { %v1010_v57 = vsel %vm1009_vm8, %v874_v27, %v1007_v59 }
 0x26e   :  { %v1011_v53 = vadd.f32 %v1010_v57, %v1008_v11 }
 0x270   :  { %1013 = vst.msk [vmem:[#allocation2] sm:$0x3] %vm16_vm3, %v1011_v53 }
 0x271   :  { %1252 = shalt.err (!%p1249_p4)
}
 0x272   :  { %1023 = dma.vmem_to_hbm [thread:$0]  %s1021_s15, 32, %s2125_s2, [#allocation3]  }
 0x273   :  { %1261 = dma.done.wait [#allocation3], 32  }
 0x274   :  { %1262 = vsyncadd [#allocation3], 4294967264 }
 0x275   :  { %1027 = vsyncpa [#allocation3], 1 }

</bundles_post_ra>
